<compile_context>
chip_gen: v7x
topology: tpu7x:2x2x1
jax: 0.10.0
libtpu: 0.0.40
codegen_flags: <defaults>
</compile_context>

<pallas_src>
import jax
import jax.numpy as jnp
import numpy as np
from jax import lax
from jax.experimental import pallas as pl
from jax.experimental.pallas import tpu as pltpu

HIDDEN = 32
INPUT = 1
GATES = 4 * HIDDEN          # 128 gate lanes, PyTorch order [i, f, g, o]
_UNROLL_MAX = 64            # fully unroll the recurrence up to this many timesteps

# ---- parameter/state slab layout: one (SLAB_ROWS, 4H) f32 operand -------------
ROW_WHH = 0                 # rows [0, H)   : W_hh^T                  (H, 4H)
ROW_WIH = HIDDEN            # row H         : W_ih^T (input_size==1)  (1, 4H)
ROW_B = HIDDEN + 1          # row H+1       : b_ih + b_hh             (1, 4H)
ROW_WLIN = HIDDEN + 2       # row H+2       : linear weight, lanes [0,H)
ROW_BLIN = HIDDEN + 3       # row H+3       : linear bias (broadcast row)
ROW_GS = HIDDEN + 4         # row H+4       : gate activation scale/mul
ROW_GA = HIDDEN + 5         # row H+5       : gate activation add
ROW_H0 = HIDDEN + 6         # row H+6       : initial hidden state, lanes [0,H)
ROW_C0 = HIDDEN + 7         # row H+7       : initial cell state,   lanes [0,H)
SLAB_ROWS = HIDDEN + 8      # 40 rows (multiple of 8 sublanes)


def lstm_linear_kernel(x_ref, slab_ref, out_ref, hs_ref, pre_ref):
    """Single-core kernel: full LSTM recurrence + output projection.

    x_ref    : (T, I)          time-major inputs (B == 1 folded, I == 1)
    slab_ref : (SLAB_ROWS, 4H) packed weights / bias / init state (see layout above)
    out_ref  : (3, max(T, H))  row 0 = per-step linear output (lanes [0,T)),
                               row 1 = h_n (lanes [0,H)), row 2 = c_n
    hs_ref   : (T, H)          VMEM scratch: every step's hidden state
    pre_ref  : (T, 4H)         VMEM scratch: hoisted input projection + bias
    """
    T, _ = x_ref.shape
    H = HIDDEN

    # ---- loop-invariant loads (hoisted out of the recurrence) -------------------
    whh_bf = slab_ref[ROW_WHH:ROW_WHH + H, :].astype(jnp.bfloat16)   # (H, 4H) bf16
    wih = slab_ref[ROW_WIH:ROW_WIH + 1, :]                           # (1, 4H)
    b = slab_ref[ROW_B:ROW_B + 1, :]                                 # (1, 4H)
    g_scale = slab_ref[ROW_GS:ROW_GS + 1, :]                         # (1, 4H)
    g_add = slab_ref[ROW_GA:ROW_GA + 1, :]                           # (1, 4H)
    h0 = slab_ref[ROW_H0:ROW_H0 + 1, 0:H]                            # (1, H)
    c0 = slab_ref[ROW_C0:ROW_C0 + 1, 0:H]                            # (1, H)

    # ---- input projection for all timesteps at once ------------------------------
    # input_size == 1: (T,1) * (1,4H) broadcast multiply — no MXU needed.
    pre_ref[...] = x_ref[...] * wih + b

    def step(t, carry):
        h, c = carry                                                  # (1, H) each
        # Serial critical path: single-pass bf16 MXU dot, f32 accumulate.
        gates = pre_ref[pl.ds(t, 1), :] + jnp.dot(
            h.astype(jnp.bfloat16), whh_bf,
            preferred_element_type=jnp.float32)                       # (1, 4H) f32
        # One EUP push for all four gates:
        #   sigmoid(x) = 0.5*tanh(0.5x)+0.5 on i/f/o lanes, tanh(x) on g lanes.
        act = g_scale * jnp.tanh(g_scale * gates) + g_add
        i_g = act[:, 0:H]
        f_g = act[:, H:2 * H]
        g_g = act[:, 2 * H:3 * H]
        o_g = act[:, 3 * H:4 * H]
        c_new = f_g * c + i_g * g_g
        h_new = o_g * jnp.tanh(c_new)
        hs_ref[pl.ds(t, 1), :] = h_new
        return (h_new, c_new)

    carry0 = (h0, c0)
    if T <= _UNROLL_MAX:
        # Fully unrolled: static offsets for pre/hs + cross-step LLO visibility.
        carry = carry0
        for t in range(T):
            carry = step(t, carry)
        h_final, c_final = carry
    else:
        # TODO(synk): replace with a time-chunked, pipelined grid for very long T.
        h_final, c_final = lax.fori_loop(0, T, step, carry0, unroll=8)

    # ---- output projection + packed epilogue stores ------------------------------
    wlin = slab_ref[ROW_WLIN:ROW_WLIN + 1, 0:H]                       # (1, H)
    blin = slab_ref[ROW_BLIN:ROW_BLIN + 1, 0:1]                       # (1, 1)
    # (1, H) . (T, H)^T -> (1, T): contract over H, lane-dense row output.
    r_row = lax.dot_general(
        wlin, hs_ref[...],
        dimension_numbers=(((1,), (1,)), ((), ())),
        preferred_element_type=jnp.float32) + blin
    out_ref[0:1, 0:T] = r_row
    out_ref[1:2, 0:H] = h_final
    out_ref[2:3, 0:H] = c_final


def rnn_forward(x, params, state):
    """Mirrors RNN.forward(input, state): returns (r_out, (h_n, c_n))."""
    h0, c0 = state                      # each (1, B, H) with B == 1
    T, B, I = x.shape
    assert B == 1 and I == INPUT
    H = HIDDEN

    x2 = x.reshape(T, I).astype(jnp.float32)
    pad_w = GATES - H
    h_row = jnp.pad(h0.reshape(1, H).astype(jnp.float32), ((0, 0), (0, pad_w)))
    c_row = jnp.pad(c0.reshape(1, H).astype(jnp.float32), ((0, 0), (0, pad_w)))
    slab = jnp.concatenate([params["slab"], h_row, c_row], axis=0)   # (SLAB_ROWS, 4H)

    L = max(T, H)
    vmem = pl.BlockSpec(memory_space=pltpu.MemorySpace.VMEM)

    # x/pre/hs lane-pad to ~1.5 KiB per step combined; give 2x headroom and cap at
    # 64 MiB (v7x physical VMEM).  TODO(synk): batch>1 callers should expose a
    # 'parallel' grid axis so v7x's second TensorCore is used.
    approx_bytes = 4 * (3 * GATES * T + SLAB_ROWS * GATES + 3 * L) + (1 << 20)
    vmem_limit = int(min(max(2 * approx_bytes, 16 * 2 ** 20), 64 * 2 ** 20))

    out = pl.pallas_call(
        lstm_linear_kernel,
        out_shape=jax.ShapeDtypeStruct((3, L), jnp.float32),
        in_specs=[vmem, vmem],
        out_specs=vmem,
        scratch_shapes=[pltpu.VMEM((T, H), jnp.float32),
                        pltpu.VMEM((T, 4 * H), jnp.float32)],
        compiler_params=pltpu.CompilerParams(vmem_limit_bytes=vmem_limit),
    )(x2, slab)

    r_out = out[0:1, 0:T].reshape(T, B, 1)
    h_n = out[1:2, 0:H].reshape(1, B, H)
    c_n = out[2:3, 0:H].reshape(1, B, H)
    return r_out, (h_n, c_n)


def init_params(key):
    """Deterministic init matching PyTorch shapes (LSTM + Linear)."""
    H, I = HIDDEN, INPUT
    k_lstm = 1.0 / np.sqrt(H)
    k_lin = 1.0 / np.sqrt(H)
    ks = jax.random.split(key, 6)
    w_ih = jax.random.uniform(ks[0], (4 * H, I), jnp.float32, -k_lstm, k_lstm)
    w_hh = jax.random.uniform(ks[1], (4 * H, H), jnp.float32, -k_lstm, k_lstm)
    b_ih = jax.random.uniform(ks[2], (4 * H,), jnp.float32, -k_lstm, k_lstm)
    b_hh = jax.random.uniform(ks[3], (4 * H,), jnp.float32, -k_lstm, k_lstm)
    w_lin = jax.random.uniform(ks[4], (1, H), jnp.float32, -k_lin, k_lin)
    b_lin = jax.random.uniform(ks[5], (1,), jnp.float32, -k_lin, k_lin)

    wih_t = w_ih.T                              # (I, 4H) == (1, 4H)
    whh_t = w_hh.T                              # (H, 4H)
    b = (b_ih + b_hh).reshape(1, 4 * H)

    # Per-lane gate-activation constants for the single-tanh formulation
    # (PyTorch gate order [i, f, g, o]; g-gate lanes keep plain tanh).
    lane = np.arange(4 * H)
    is_g = (lane >= 2 * H) & (lane < 3 * H)
    g_scale = jnp.asarray(np.where(is_g, 1.0, 0.5).astype(np.float32).reshape(1, 4 * H))
    g_add = jnp.asarray(np.where(is_g, 0.0, 0.5).astype(np.float32).reshape(1, 4 * H))

    pad = lambda a: jnp.pad(a, ((0, 0), (0, 4 * H - a.shape[1])))
    slab = jnp.concatenate([
        whh_t,                                               # rows [0, H)
        wih_t,                                               # ROW_WIH
        b,                                                   # ROW_B
        pad(w_lin),                                          # ROW_WLIN
        jnp.broadcast_to(b_lin.reshape(1, 1), (1, 4 * H)),   # ROW_BLIN
        g_scale,                                             # ROW_GS
        g_add,                                               # ROW_GA
    ], axis=0)                                               # (ROW_H0, 4H)

    return {
        "slab": slab,
        # raw pieces kept for the pure-JAX reference
        "wih_t": wih_t,
        "whh_t": whh_t,
        "b": b,
        "wlin_row": w_lin,
        "blin": b_lin.reshape(1, 1),
    }


def reference_forward(x, params, state):
    """Pure-JAX f32 reference (lax.scan) for correctness checking."""
    h0, c0 = state
    T, B, I = x.shape
    H = HIDDEN
    x2 = x.reshape(T, I)

    def step(carry, x_t):
        h, c = carry
        gates = (x_t[None, :] @ params["wih_t"]
                 + h @ params["whh_t"] + params["b"])
        i_g = jax.nn.sigmoid(gates[:, 0:H])
        f_g = jax.nn.sigmoid(gates[:, H:2 * H])
        g_g = jnp.tanh(gates[:, 2 * H:3 * H])
        o_g = jax.nn.sigmoid(gates[:, 3 * H:4 * H])
        c_new = f_g * c + i_g * g_g
        h_new = o_g * jnp.tanh(c_new)
        return (h_new, c_new), h_new

    (h_f, c_f), hs = jax.lax.scan(step, (h0.reshape(B, H), c0.reshape(B, H)), x2)
    r_out = hs.reshape(T, H) @ params["wlin_row"].T + params["blin"]
    return r_out.reshape(T, B, 1), (h_f.reshape(1, B, H), c_f.reshape(1, B, H))


if __name__ == "__main__":
    key = jax.random.PRNGKey(0)
    k_p, k_x1, k_x2, k_h, k_c = jax.random.split(key, 5)

    B = 1
    params = init_params(k_p)
    h_n0 = jax.random.normal(k_h, (1, B, HIDDEN), jnp.float32)   # (num_layers, B, H)
    c_n0 = jax.random.normal(k_c, (1, B, HIDDEN), jnp.float32)
    state = (h_n0, c_n0)

    def check(T, kx):
        x = jax.random.normal(kx, (T, B, INPUT), jnp.float32)    # (seq, batch, input)
        r_out, (hT, cT) = rnn_forward(x, params, state)
        jax.block_until_ready((r_out, hT, cT))
        r_ref, (hT_ref, cT_ref) = reference_forward(x, params, state)
        # Recurrent matmul intentionally runs in single-pass bf16 on the MXU
        # (f32 accumulation), so the tolerance vs. the pure-f32 reference is
        # slightly looser than 1e-3.
        tol = dict(atol=2e-2, rtol=2e-2)
        assert np.allclose(np.asarray(r_out), np.asarray(r_ref), **tol)
        assert np.allclose(np.asarray(hT), np.asarray(hT_ref), **tol)
        assert np.allclose(np.asarray(cT), np.asarray(cT_ref), **tol)

    check(8, k_x1)     # fully-unrolled path
    check(96, k_x2)    # fori_loop fallback path (T > _UNROLL_MAX)

    print("KERNEL_OK")
</pallas_src>

<mosaic_0001>
module attributes {stable_mosaic.version = 11 : i64} {
  func.func @lstm_linear_kernel(%arg0: memref<8x1xf32, #tpu.memory_space<vmem>>, %arg1: memref<40x128xf32, #tpu.memory_space<vmem>>, %arg2: memref<3x32xf32, #tpu.memory_space<vmem>>, %arg3: memref<8x32xf32, #tpu.memory_space<vmem>>, %arg4: memref<8x128xf32, #tpu.memory_space<vmem>>) attributes {dimension_semantics = [], scalar_prefetch = 0 : i64, scratch_operands = 2 : i64, tpu.core_type = #tpu.core_type<tc>} {
    %c0 = arith.constant 0 : index
    %c0_0 = arith.constant 0 : index
    %0 = vector.load %arg1[%c0, %c0_0] : memref<40x128xf32, #tpu.memory_space<vmem>>, vector<32x128xf32>
    %1 = arith.truncf %0 : vector<32x128xf32> to vector<32x128xbf16>
    %c32 = arith.constant 32 : index
    %c0_1 = arith.constant 0 : index
    %2 = vector.load %arg1[%c32, %c0_1] : memref<40x128xf32, #tpu.memory_space<vmem>>, vector<1x128xf32>
    %c33 = arith.constant 33 : index
    %c0_2 = arith.constant 0 : index
    %3 = vector.load %arg1[%c33, %c0_2] : memref<40x128xf32, #tpu.memory_space<vmem>>, vector<1x128xf32>
    %c36 = arith.constant 36 : index
    %c0_3 = arith.constant 0 : index
    %4 = vector.load %arg1[%c36, %c0_3] : memref<40x128xf32, #tpu.memory_space<vmem>>, vector<1x128xf32>
    %c37 = arith.constant 37 : index
    %c0_4 = arith.constant 0 : index
    %5 = vector.load %arg1[%c37, %c0_4] : memref<40x128xf32, #tpu.memory_space<vmem>>, vector<1x128xf32>
    %c38 = arith.constant 38 : index
    %c0_5 = arith.constant 0 : index
    %6 = vector.load %arg1[%c38, %c0_5] : memref<40x128xf32, #tpu.memory_space<vmem>>, vector<1x32xf32>
    %c39 = arith.constant 39 : index
    %c0_6 = arith.constant 0 : index
    %7 = vector.load %arg1[%c39, %c0_6] : memref<40x128xf32, #tpu.memory_space<vmem>>, vector<1x32xf32>
    %c0_7 = arith.constant 0 : index
    %c0_8 = arith.constant 0 : index
    %8 = vector.load %arg0[%c0_7, %c0_8] : memref<8x1xf32, #tpu.memory_space<vmem>>, vector<8x1xf32>
    %9 = vector.broadcast %8 : vector<8x1xf32> to vector<8x128xf32>
    %10 = vector.broadcast %2 : vector<1x128xf32> to vector<8x128xf32>
    %11 = arith.mulf %9, %10 : vector<8x128xf32>
    %12 = vector.broadcast %3 : vector<1x128xf32> to vector<8x128xf32>
    %13 = arith.addf %11, %12 : vector<8x128xf32>
    %c0_9 = arith.constant 0 : index
    %c0_10 = arith.constant 0 : index
    %14 = vector.load %arg4[%c0_9, %c0_10] : memref<8x128xf32, #tpu.memory_space<vmem>>, vector<8x128xf32>
    tpu.vector_store %arg4[%c0_9, %c0_10], %13 {strides = array<i32>} : memref<8x128xf32, #tpu.memory_space<vmem>>, vector<8x128xf32>,
    %c0_11 = arith.constant 0 : index
    %c0_12 = arith.constant 0 : index
    %15 = vector.load %arg4[%c0_11, %c0_12] : memref<8x128xf32, #tpu.memory_space<vmem>>, vector<1x128xf32>
    %16 = arith.truncf %6 : vector<1x32xf32> to vector<1x32xbf16>
    %cst = arith.constant dense<0.000000e+00> : vector<1x128xf32>
    %17 = tpu.matmul %16, %1, %cst {dimension_numbers = #tpu.dot_dimension_numbers<[1], [0], [0], [1], [0, 0, 1, 1], [], []>} : vector<1x32xbf16>, vector<32x128xbf16>, vector<1x128xf32> -> vector<1x128xf32>
    %18 = arith.addf %15, %17 : vector<1x128xf32>
    %19 = arith.mulf %4, %18 : vector<1x128xf32>
    %20 = math.tanh %19 : vector<1x128xf32>
    %21 = arith.mulf %4, %20 : vector<1x128xf32>
    %22 = arith.addf %21, %5 : vector<1x128xf32>
    %23 = vector.extract_strided_slice %22 {offsets = [0, 0], sizes = [1, 32], strides = [1, 1]} : vector<1x128xf32> to vector<1x32xf32>
    %24 = vector.extract_strided_slice %22 {offsets = [0, 32], sizes = [1, 32], strides = [1, 1]} : vector<1x128xf32> to vector<1x32xf32>
    %25 = vector.extract_strided_slice %22 {offsets = [0, 64], sizes = [1, 32], strides = [1, 1]} : vector<1x128xf32> to vector<1x32xf32>
    %26 = vector.extract_strided_slice %22 {offsets = [0, 96], sizes = [1, 32], strides = [1, 1]} : vector<1x128xf32> to vector<1x32xf32>
    %27 = arith.mulf %24, %7 : vector<1x32xf32>
    %28 = arith.mulf %23, %25 : vector<1x32xf32>
    %29 = arith.addf %27, %28 : vector<1x32xf32>
    %30 = math.tanh %29 : vector<1x32xf32>
    %31 = arith.mulf %26, %30 : vector<1x32xf32>
    %c0_13 = arith.constant 0 : index
    %c0_14 = arith.constant 0 : index
    %32 = vector.load %arg3[%c0_13, %c0_14] : memref<8x32xf32, #tpu.memory_space<vmem>>, vector<1x32xf32>
    tpu.vector_store %arg3[%c0_13, %c0_14], %31 {strides = array<i32>} : memref<8x32xf32, #tpu.memory_space<vmem>>, vector<1x32xf32>,
    %c1 = arith.constant 1 : index
    %c0_15 = arith.constant 0 : index
    %33 = vector.load %arg4[%c1, %c0_15] : memref<8x128xf32, #tpu.memory_space<vmem>>, vector<1x128xf32>
    %34 = arith.truncf %31 : vector<1x32xf32> to vector<1x32xbf16>
    %cst_16 = arith.constant dense<0.000000e+00> : vector<1x128xf32>
    %35 = tpu.matmul %34, %1, %cst_16 {dimension_numbers = #tpu.dot_dimension_numbers<[1], [0], [0], [1], [0, 0, 1, 1], [], []>} : vector<1x32xbf16>, vector<32x128xbf16>, vector<1x128xf32> -> vector<1x128xf32>
    %36 = arith.addf %33, %35 : vector<1x128xf32>
    %37 = arith.mulf %4, %36 : vector<1x128xf32>
    %38 = math.tanh %37 : vector<1x128xf32>
    %39 = arith.mulf %4, %38 : vector<1x128xf32>
    %40 = arith.addf %39, %5 : vector<1x128xf32>
    %41 = vector.extract_strided_slice %40 {offsets = [0, 0], sizes = [1, 32], strides = [1, 1]} : vector<1x128xf32> to vector<1x32xf32>
    %42 = vector.extract_strided_slice %40 {offsets = [0, 32], sizes = [1, 32], strides = [1, 1]} : vector<1x128xf32> to vector<1x32xf32>
    %43 = vector.extract_strided_slice %40 {offsets = [0, 64], sizes = [1, 32], strides = [1, 1]} : vector<1x128xf32> to vector<1x32xf32>
    %44 = vector.extract_strided_slice %40 {offsets = [0, 96], sizes = [1, 32], strides = [1, 1]} : vector<1x128xf32> to vector<1x32xf32>
    %45 = arith.mulf %42, %29 : vector<1x32xf32>
    %46 = arith.mulf %41, %43 : vector<1x32xf32>
    %47 = arith.addf %45, %46 : vector<1x32xf32>
    %48 = math.tanh %47 : vector<1x32xf32>
    %49 = arith.mulf %44, %48 : vector<1x32xf32>
    %c1_17 = arith.constant 1 : index
    %c0_18 = arith.constant 0 : index
    %50 = vector.load %arg3[%c1_17, %c0_18] : memref<8x32xf32, #tpu.memory_space<vmem>>, vector<1x32xf32>
    tpu.vector_store %arg3[%c1_17, %c0_18], %49 {strides = array<i32>} : memref<8x32xf32, #tpu.memory_space<vmem>>, vector<1x32xf32>,
    %c2 = arith.constant 2 : index
    %c0_19 = arith.constant 0 : index
    %51 = vector.load %arg4[%c2, %c0_19] : memref<8x128xf32, #tpu.memory_space<vmem>>, vector<1x128xf32>
    %52 = arith.truncf %49 : vector<1x32xf32> to vector<1x32xbf16>
    %cst_20 = arith.constant dense<0.000000e+00> : vector<1x128xf32>
    %53 = tpu.matmul %52, %1, %cst_20 {dimension_numbers = #tpu.dot_dimension_numbers<[1], [0], [0], [1], [0, 0, 1, 1], [], []>} : vector<1x32xbf16>, vector<32x128xbf16>, vector<1x128xf32> -> vector<1x128xf32>
    %54 = arith.addf %51, %53 : vector<1x128xf32>
    %55 = arith.mulf %4, %54 : vector<1x128xf32>
    %56 = math.tanh %55 : vector<1x128xf32>
    %57 = arith.mulf %4, %56 : vector<1x128xf32>
    %58 = arith.addf %57, %5 : vector<1x128xf32>
    %59 = vector.extract_strided_slice %58 {offsets = [0, 0], sizes = [1, 32], strides = [1, 1]} : vector<1x128xf32> to vector<1x32xf32>
    %60 = vector.extract_strided_slice %58 {offsets = [0, 32], sizes = [1, 32], strides = [1, 1]} : vector<1x128xf32> to vector<1x32xf32>
    %61 = vector.extract_strided_slice %58 {offsets = [0, 64], sizes = [1, 32], strides = [1, 1]} : vector<1x128xf32> to vector<1x32xf32>
    %62 = vector.extract_strided_slice %58 {offsets = [0, 96], sizes = [1, 32], strides = [1, 1]} : vector<1x128xf32> to vector<1x32xf32>
    %63 = arith.mulf %60, %47 : vector<1x32xf32>
    %64 = arith.mulf %59, %61 : vector<1x32xf32>
    %65 = arith.addf %63, %64 : vector<1x32xf32>
    %66 = math.tanh %65 : vector<1x32xf32>
    %67 = arith.mulf %62, %66 : vector<1x32xf32>
    %c2_21 = arith.constant 2 : index
    %c0_22 = arith.constant 0 : index
    %68 = vector.load %arg3[%c2_21, %c0_22] : memref<8x32xf32, #tpu.memory_space<vmem>>, vector<1x32xf32>
    tpu.vector_store %arg3[%c2_21, %c0_22], %67 {strides = array<i32>} : memref<8x32xf32, #tpu.memory_space<vmem>>, vector<1x32xf32>,
    %c3 = arith.constant 3 : index
    %c0_23 = arith.constant 0 : index
    %69 = vector.load %arg4[%c3, %c0_23] : memref<8x128xf32, #tpu.memory_space<vmem>>, vector<1x128xf32>
    %70 = arith.truncf %67 : vector<1x32xf32> to vector<1x32xbf16>
    %cst_24 = arith.constant dense<0.000000e+00> : vector<1x128xf32>
    %71 = tpu.matmul %70, %1, %cst_24 {dimension_numbers = #tpu.dot_dimension_numbers<[1], [0], [0], [1], [0, 0, 1, 1], [], []>} : vector<1x32xbf16>, vector<32x128xbf16>, vector<1x128xf32> -> vector<1x128xf32>
    %72 = arith.addf %69, %71 : vector<1x128xf32>
    %73 = arith.mulf %4, %72 : vector<1x128xf32>
    %74 = math.tanh %73 : vector<1x128xf32>
    %75 = arith.mulf %4, %74 : vector<1x128xf32>
    %76 = arith.addf %75, %5 : vector<1x128xf32>
    %77 = vector.extract_strided_slice %76 {offsets = [0, 0], sizes = [1, 32], strides = [1, 1]} : vector<1x128xf32> to vector<1x32xf32>
    %78 = vector.extract_strided_slice %76 {offsets = [0, 32], sizes = [1, 32], strides = [1, 1]} : vector<1x128xf32> to vector<1x32xf32>
    %79 = vector.extract_strided_slice %76 {offsets = [0, 64], sizes = [1, 32], strides = [1, 1]} : vector<1x128xf32> to vector<1x32xf32>
    %80 = vector.extract_strided_slice %76 {offsets = [0, 96], sizes = [1, 32], strides = [1, 1]} : vector<1x128xf32> to vector<1x32xf32>
    %81 = arith.mulf %78, %65 : vector<1x32xf32>
    %82 = arith.mulf %77, %79 : vector<1x32xf32>
    %83 = arith.addf %81, %82 : vector<1x32xf32>
    %84 = math.tanh %83 : vector<1x32xf32>
    %85 = arith.mulf %80, %84 : vector<1x32xf32>
    %c3_25 = arith.constant 3 : index
    %c0_26 = arith.constant 0 : index
    %86 = vector.load %arg3[%c3_25, %c0_26] : memref<8x32xf32, #tpu.memory_space<vmem>>, vector<1x32xf32>
    tpu.vector_store %arg3[%c3_25, %c0_26], %85 {strides = array<i32>} : memref<8x32xf32, #tpu.memory_space<vmem>>, vector<1x32xf32>,
    %c4 = arith.constant 4 : index
    %c0_27 = arith.constant 0 : index
    %87 = vector.load %arg4[%c4, %c0_27] : memref<8x128xf32, #tpu.memory_space<vmem>>, vector<1x128xf32>
    %88 = arith.truncf %85 : vector<1x32xf32> to vector<1x32xbf16>
    %cst_28 = arith.constant dense<0.000000e+00> : vector<1x128xf32>
    %89 = tpu.matmul %88, %1, %cst_28 {dimension_numbers = #tpu.dot_dimension_numbers<[1], [0], [0], [1], [0, 0, 1, 1], [], []>} : vector<1x32xbf16>, vector<32x128xbf16>, vector<1x128xf32> -> vector<1x128xf32>
    %90 = arith.addf %87, %89 : vector<1x128xf32>
    %91 = arith.mulf %4, %90 : vector<1x128xf32>
    %92 = math.tanh %91 : vector<1x128xf32>
    %93 = arith.mulf %4, %92 : vector<1x128xf32>
    %94 = arith.addf %93, %5 : vector<1x128xf32>
    %95 = vector.extract_strided_slice %94 {offsets = [0, 0], sizes = [1, 32], strides = [1, 1]} : vector<1x128xf32> to vector<1x32xf32>
    %96 = vector.extract_strided_slice %94 {offsets = [0, 32], sizes = [1, 32], strides = [1, 1]} : vector<1x128xf32> to vector<1x32xf32>
    %97 = vector.extract_strided_slice %94 {offsets = [0, 64], sizes = [1, 32], strides = [1, 1]} : vector<1x128xf32> to vector<1x32xf32>
    %98 = vector.extract_strided_slice %94 {offsets = [0, 96], sizes = [1, 32], strides = [1, 1]} : vector<1x128xf32> to vector<1x32xf32>
    %99 = arith.mulf %96, %83 : vector<1x32xf32>
    %100 = arith.mulf %95, %97 : vector<1x32xf32>
    %101 = arith.addf %99, %100 : vector<1x32xf32>
    %102 = math.tanh %101 : vector<1x32xf32>
    %103 = arith.mulf %98, %102 : vector<1x32xf32>
    %c4_29 = arith.constant 4 : index
    %c0_30 = arith.constant 0 : index
    %104 = vector.load %arg3[%c4_29, %c0_30] : memref<8x32xf32, #tpu.memory_space<vmem>>, vector<1x32xf32>
    tpu.vector_store %arg3[%c4_29, %c0_30], %103 {strides = array<i32>} : memref<8x32xf32, #tpu.memory_space<vmem>>, vector<1x32xf32>,
    %c5 = arith.constant 5 : index
    %c0_31 = arith.constant 0 : index
    %105 = vector.load %arg4[%c5, %c0_31] : memref<8x128xf32, #tpu.memory_space<vmem>>, vector<1x128xf32>
    %106 = arith.truncf %103 : vector<1x32xf32> to vector<1x32xbf16>
    %cst_32 = arith.constant dense<0.000000e+00> : vector<1x128xf32>
    %107 = tpu.matmul %106, %1, %cst_32 {dimension_numbers = #tpu.dot_dimension_numbers<[1], [0], [0], [1], [0, 0, 1, 1], [], []>} : vector<1x32xbf16>, vector<32x128xbf16>, vector<1x128xf32> -> vector<1x128xf32>
    %108 = arith.addf %105, %107 : vector<1x128xf32>
    %109 = arith.mulf %4, %108 : vector<1x128xf32>
    %110 = math.tanh %109 : vector<1x128xf32>
    %111 = arith.mulf %4, %110 : vector<1x128xf32>
    %112 = arith.addf %111, %5 : vector<1x128xf32>
    %113 = vector.extract_strided_slice %112 {offsets = [0, 0], sizes = [1, 32], strides = [1, 1]} : vector<1x128xf32> to vector<1x32xf32>
    %114 = vector.extract_strided_slice %112 {offsets = [0, 32], sizes = [1, 32], strides = [1, 1]} : vector<1x128xf32> to vector<1x32xf32>
    %115 = vector.extract_strided_slice %112 {offsets = [0, 64], sizes = [1, 32], strides = [1, 1]} : vector<1x128xf32> to vector<1x32xf32>
    %116 = vector.extract_strided_slice %112 {offsets = [0, 96], sizes = [1, 32], strides = [1, 1]} : vector<1x128xf32> to vector<1x32xf32>
    %117 = arith.mulf %114, %101 : vector<1x32xf32>
    %118 = arith.mulf %113, %115 : vector<1x32xf32>
    %119 = arith.addf %117, %118 : vector<1x32xf32>
    %120 = math.tanh %119 : vector<1x32xf32>
    %121 = arith.mulf %116, %120 : vector<1x32xf32>
    %c5_33 = arith.constant 5 : index
    %c0_34 = arith.constant 0 : index
    %122 = vector.load %arg3[%c5_33, %c0_34] : memref<8x32xf32, #tpu.memory_space<vmem>>, vector<1x32xf32>
    tpu.vector_store %arg3[%c5_33, %c0_34], %121 {strides = array<i32>} : memref<8x32xf32, #tpu.memory_space<vmem>>, vector<1x32xf32>,
    %c6 = arith.constant 6 : index
    %c0_35 = arith.constant 0 : index
    %123 = vector.load %arg4[%c6, %c0_35] : memref<8x128xf32, #tpu.memory_space<vmem>>, vector<1x128xf32>
    %124 = arith.truncf %121 : vector<1x32xf32> to vector<1x32xbf16>
    %cst_36 = arith.constant dense<0.000000e+00> : vector<1x128xf32>
    %125 = tpu.matmul %124, %1, %cst_36 {dimension_numbers = #tpu.dot_dimension_numbers<[1], [0], [0], [1], [0, 0, 1, 1], [], []>} : vector<1x32xbf16>, vector<32x128xbf16>, vector<1x128xf32> -> vector<1x128xf32>
    %126 = arith.addf %123, %125 : vector<1x128xf32>
    %127 = arith.mulf %4, %126 : vector<1x128xf32>
    %128 = math.tanh %127 : vector<1x128xf32>
    %129 = arith.mulf %4, %128 : vector<1x128xf32>
    %130 = arith.addf %129, %5 : vector<1x128xf32>
    %131 = vector.extract_strided_slice %130 {offsets = [0, 0], sizes = [1, 32], strides = [1, 1]} : vector<1x128xf32> to vector<1x32xf32>
    %132 = vector.extract_strided_slice %130 {offsets = [0, 32], sizes = [1, 32], strides = [1, 1]} : vector<1x128xf32> to vector<1x32xf32>
    %133 = vector.extract_strided_slice %130 {offsets = [0, 64], sizes = [1, 32], strides = [1, 1]} : vector<1x128xf32> to vector<1x32xf32>
    %134 = vector.extract_strided_slice %130 {offsets = [0, 96], sizes = [1, 32], strides = [1, 1]} : vector<1x128xf32> to vector<1x32xf32>
    %135 = arith.mulf %132, %119 : vector<1x32xf32>
    %136 = arith.mulf %131, %133 : vector<1x32xf32>
    %137 = arith.addf %135, %136 : vector<1x32xf32>
    %138 = math.tanh %137 : vector<1x32xf32>
    %139 = arith.mulf %134, %138 : vector<1x32xf32>
    %c6_37 = arith.constant 6 : index
    %c0_38 = arith.constant 0 : index
    %140 = vector.load %arg3[%c6_37, %c0_38] : memref<8x32xf32, #tpu.memory_space<vmem>>, vector<1x32xf32>
    tpu.vector_store %arg3[%c6_37, %c0_38], %139 {strides = array<i32>} : memref<8x32xf32, #tpu.memory_space<vmem>>, vector<1x32xf32>,
    %c7 = arith.constant 7 : index
    %c0_39 = arith.constant 0 : index
    %141 = vector.load %arg4[%c7, %c0_39] : memref<8x128xf32, #tpu.memory_space<vmem>>, vector<1x128xf32>
    %142 = arith.truncf %139 : vector<1x32xf32> to vector<1x32xbf16>
    %cst_40 = arith.constant dense<0.000000e+00> : vector<1x128xf32>
    %143 = tpu.matmul %142, %1, %cst_40 {dimension_numbers = #tpu.dot_dimension_numbers<[1], [0], [0], [1], [0, 0, 1, 1], [], []>} : vector<1x32xbf16>, vector<32x128xbf16>, vector<1x128xf32> -> vector<1x128xf32>
    %144 = arith.addf %141, %143 : vector<1x128xf32>
    %145 = arith.mulf %4, %144 : vector<1x128xf32>
    %146 = math.tanh %145 : vector<1x128xf32>
    %147 = arith.mulf %4, %146 : vector<1x128xf32>
    %148 = arith.addf %147, %5 : vector<1x128xf32>
    %149 = vector.extract_strided_slice %148 {offsets = [0, 0], sizes = [1, 32], strides = [1, 1]} : vector<1x128xf32> to vector<1x32xf32>
    %150 = vector.extract_strided_slice %148 {offsets = [0, 32], sizes = [1, 32], strides = [1, 1]} : vector<1x128xf32> to vector<1x32xf32>
    %151 = vector.extract_strided_slice %148 {offsets = [0, 64], sizes = [1, 32], strides = [1, 1]} : vector<1x128xf32> to vector<1x32xf32>
    %152 = vector.extract_strided_slice %148 {offsets = [0, 96], sizes = [1, 32], strides = [1, 1]} : vector<1x128xf32> to vector<1x32xf32>
    %153 = arith.mulf %150, %137 : vector<1x32xf32>
    %154 = arith.mulf %149, %151 : vector<1x32xf32>
    %155 = arith.addf %153, %154 : vector<1x32xf32>
    %156 = math.tanh %155 : vector<1x32xf32>
    %157 = arith.mulf %152, %156 : vector<1x32xf32>
    %c7_41 = arith.constant 7 : index
    %c0_42 = arith.constant 0 : index
    %158 = vector.load %arg3[%c7_41, %c0_42] : memref<8x32xf32, #tpu.memory_space<vmem>>, vector<1x32xf32>
    tpu.vector_store %arg3[%c7_41, %c0_42], %157 {strides = array<i32>} : memref<8x32xf32, #tpu.memory_space<vmem>>, vector<1x32xf32>,
    %c34 = arith.constant 34 : index
    %c0_43 = arith.constant 0 : index
    %159 = vector.load %arg1[%c34, %c0_43] : memref<40x128xf32, #tpu.memory_space<vmem>>, vector<1x32xf32>
    %c35 = arith.constant 35 : index
    %c0_44 = arith.constant 0 : index
    %160 = vector.load %arg1[%c35, %c0_44] : memref<40x128xf32, #tpu.memory_space<vmem>>, vector<1x1xf32>
    %c0_45 = arith.constant 0 : index
    %c0_46 = arith.constant 0 : index
    %161 = vector.load %arg3[%c0_45, %c0_46] : memref<8x32xf32, #tpu.memory_space<vmem>>, vector<8x32xf32>
    %cst_47 = arith.constant dense<0.000000e+00> : vector<1x8xf32>
    %162 = tpu.matmul %159, %161, %cst_47 {dimension_numbers = #tpu.dot_dimension_numbers<[1], [1], [0], [0], [0, 0, 1, 0], [], []>} : vector<1x32xf32>, vector<8x32xf32>, vector<1x8xf32> -> vector<1x8xf32>
    %163 = vector.broadcast %160 : vector<1x1xf32> to vector<1x8xf32>
    %164 = arith.addf %162, %163 : vector<1x8xf32>
    %c0_48 = arith.constant 0 : index
    %c0_49 = arith.constant 0 : index
    %165 = vector.load %arg2[%c0_48, %c0_49] : memref<3x32xf32, #tpu.memory_space<vmem>>, vector<1x8xf32>
    tpu.vector_store %arg2[%c0_48, %c0_49], %164 {strides = array<i32>} : memref<3x32xf32, #tpu.memory_space<vmem>>, vector<1x8xf32>,
    %c1_50 = arith.constant 1 : index
    %c0_51 = arith.constant 0 : index
    %166 = vector.load %arg2[%c1_50, %c0_51] : memref<3x32xf32, #tpu.memory_space<vmem>>, vector<1x32xf32>
    tpu.vector_store %arg2[%c1_50, %c0_51], %157 {strides = array<i32>} : memref<3x32xf32, #tpu.memory_space<vmem>>, vector<1x32xf32>,
    %c2_52 = arith.constant 2 : index
    %c0_53 = arith.constant 0 : index
    %167 = vector.load %arg2[%c2_52, %c0_53] : memref<3x32xf32, #tpu.memory_space<vmem>>, vector<1x32xf32>
    tpu.vector_store %arg2[%c2_52, %c0_53], %155 {strides = array<i32>} : memref<3x32xf32, #tpu.memory_space<vmem>>, vector<1x32xf32>,
    return
  }
}

</mosaic_0001>

<bundles_post_ra>
// kernel: tpu_custom_call.1
= control target key start
LH: loop header
LB: loop body
LE: loop exit
PB: predicated region body
PF: predicated region fallthrough
CT: control target
= control target key end

     0   :  { %7 = vsyncpa [#allocation5], 0  ;;  %s1190_s0 = inlined_call_operand.vmem [shape: f32[8,1], index: 0, kind: input, shape index: {}]   ;;  %s1191_s1 = inlined_call_operand.hbm [shape: f32[40,128], index: 1, kind: input, shape index: {}]   ;;  %s1192_s2 = inlined_call_operand.hbm [shape: f32[3,32], index: 2, kind: output, shape index: {}]  }
   0x1   :  { %8 = vsyncpa [#allocation6], 0  ;;  %s965_s9 = smov [#allocation4]   ;;  %s917_s13 = scalar_lea.hbm %s1191_s1, 640 }
   0x2   :  { %s16_s10 = sshll.u32 %s965_s9, 4  ;;  %p918_p0 = scmp.ne.s32.totalorder %s1191_s1, %s917_s13  ;;  %s17_s10 = int_to_ptr.vmem [resolvable:$true] %s16_s10 }
   0x3   :  { %p921_p1 = scmp.lt.u32.totalorder %s917_s13, %s1191_s1 }
   0x5   :  { %p923_p2 = pnand %p921_p1, %p918_p0 }
   0x7   :  { %926 = shalt.err (!%p923_p2)
}
   0x8   :  { %s927_s18 = scalar_lea.vmem %s17_s10, 640  ;;  %p932_p4 = scmp.lt.s32.totalorder %s17_s10, %s17_s10 }
   0x9   :  { %p928_p3 = scmp.ne.s32.totalorder %s17_s10, %s927_s18  ;;  %p933_p5 = scmp.lt.s32.totalorder %s927_s18, %s927_s18 }
   0xb   :  { %p934_p6 = por %p933_p5, %p932_p4 }
   0xd   :  { %p935_p7 = pnand %p934_p6, %p928_p3 }
   0xf   :  { %938 = shalt.err (!%p935_p7)
}
  0x10   :  { %s966_s19 = smov 128   ;;  %s967_s20 = smov 8  }
  0x11   :  { %22 = dma.hbm_to_vmem [thread:$0]  %s1191_s1, 640, %s17_s10, [#allocation5], %s966_s19, %s966_s19, %s967_s20  }
  0x12   :  { %961 = dma.done.wait [#allocation5], 640  }
  0x13   :  { %962 = vsyncadd [#allocation5], 4294966656  ;;  %v968_v0 = vmov 0.0   ;;  %vm969_vm0 = vmmov 0   ;;  %v970_v1 = vmov 0   ;;  %v27_v2 = vld [vmem:[#allocation4] sm:$0xff] }
  0x14   :  { %804 = vmatprep.subr.bf16.mxu0 %v968_v0  ;;  %808 = vmatprep.mubr.msk.bf16.mxu0 %vm969_vm0, %v968_v0  ;;  %v28_v3 = vld [vmem:[#allocation4 + $0x8] sm:$0xff]  ;;  %v29_v4 = vld [vmem:[#allocation4 + $0x10] sm:$0xff]  ;;  %v30_v6 = vld [vmem:[#allocation4 + $0x18] sm:$0xff]  ;;  %s971_s24 = smov 32   ;;  %vm58_vm1 = vcmask 261120   ;;  %vm132_vm2 = vcmask 253952  }
  0x15   :  { %883 = vset.pattern.permute.xlu0 %v970_v1  ;;  %812 = vmatprep.subr.bf16.mxu1 %v968_v0  ;;  %v1008_v5 = vpack.c.bf16 %v28_v3, %v27_v2  ;;  %v39_v7 = vld [vmem:[%s1190_s0] sm:$0xff]  ;;  %v38_v8 = vld [vmem:[#allocation4 + $0x27] sm:$0x1]  ;;  %v1014_v9 = vpack.c.bf16 %v30_v6, %v29_v4  ;;  %v37_v10 = vld [vmem:[#allocation4 + $0x26] sm:$0x1]  ;;  %s972_s0 = smov 64  }
  0x16   :  { %816 = vmatprep.mubr.msk.bf16.mxu1 %vm969_vm0, %v968_v0  ;;  %884 = vset.pattern.permute.xlu1 %v970_v1  ;;  %v57_v11 = vpack.c.bf16 %v37_v10, %v37_v10  ;;  %v766_v12 = vld [vmem:[#allocation4 + $0x20] ss:$0 sm:$0xff]  ;;  %v767_v14 = vld [vmem:[#allocation4 + $0x21] ss:$0 sm:$0xff]  ;;  %v1031_v18 = vld [vmem:[#allocation4 + $0x24] sm:$0x1] }
  0x17   :  { %42 = vperm.xlu0 %883, %v39_v7   ;;  %805 = vmatpush3.bf16.msra.mxu0 %v1008_v5  ;;  %v1034_v26 = vld [vmem:[#allocation4 + $0x25] sm:$0x1]  ;;  %s973_s25 = smov 96   ;;  %s974_s26 = smov [#allocation7]   ;;  %vm743_vm3 = vcmask 57344  }
  0x18   :  { %108 = vrot.lane.b32.xlu1 %v38_v8, %s971_s24  ;;  %806 = vmatprep.subr.bf16.mxu0 %v968_v0  ;;  %s757_s27 = sshll.u32 %s974_s26, 4  ;;  %s758_s27 = int_to_ptr.vmem [resolvable:$true] %s757_s27 }
  0x19   :  { %813 = vmatpush3.bf16.msra.mxu1 %v1008_v5  ;;  %s939_s28 = scalar_lea.vmem %s758_s27, 64  ;;  %p944_p9 = scmp.lt.s32.totalorder %s758_s27, %s758_s27 }
  0x1a   :  { %814 = vmatprep.subr.bf16.mxu1 %v968_v0  ;;  %p940_p8 = scmp.ne.s32.totalorder %s758_s27, %s939_s28  ;;  %p945_p10 = scmp.lt.s32.totalorder %s939_s28, %s939_s28 }
  0x1b   :  { %807 = vmatpush3.bf16.msra.mxu0 %v1014_v9 }
  0x1c   :  { %820 = vmatprep.subr.bf16.mxu0 %v968_v0  ;;  %p946_p11 = por %p945_p10, %p944_p9 }
  0x1d   :  { %815 = vmatpush3.bf16.msra.mxu1 %v1014_v9 }
  0x1e   :  { %828 = vmatprep.subr.bf16.mxu1 %v968_v0  ;;  %809 = vmatmul.mubr.msk.bf16.vlgmr.msra.gmra.mrb[0].mxu0 %vm58_vm1, %v57_v11  ;;  %p947_p12 = pnand %p946_p11, %p940_p8 }
  0x1f   :  { %821 = vmatpush3.bf16.msra.mxu0 %v1008_v5  ;;  %824 = vmatprep.mubr.msk.bf16.mxu0 %vm969_vm0, %v968_v0 }
  0x20   :  { %822 = vmatprep.subr.bf16.mxu0 %v968_v0 }
  0x23   :  { %823 = vmatpush3.bf16.msra.mxu0 %v1014_v9 }
  0x24   :  { %836 = vmatprep.subr.bf16.mxu0 %v968_v0 }
  0x8a   :  { %v109_v31 = vpop.permute.xlu1 %108 }
  0x96   :  { %v43_v13 = vpop.permute.xlu0 %42 }
  0x97   :  { %v49_v15 = vmul.f32 %v766_v12, %v43_v13 }
  0x99   :  { %v54_v16 = vadd.f32 %v767_v14, %v49_v15 }
  0x9b   :  { %55 = vst [vmem:[#allocation3] sm:$0xff] %v54_v16 }
  0xa2   :  { %v56_v17 = vld [vmem:[#allocation3] sm:$0x1]  ;;  %v134_v40 = vld [vmem:[#allocation3 + $0x1] sm:$0x1]  ;;  %v209_v60 = vld [vmem:[#allocation3 + $0x2] sm:$0x1] }
  0xf1   :  { %v96_v19 = vpop.f32.mrb[0].mxu0 }
  0xf2   :  { %v102_v20 = vadd.f32 %v96_v19, %v56_v17  ;;  %v810_v21 = vpop.f32.mrb[1].mxu0 }
  0xf3   :  { %v99_v22 = vpop.f32.mrb[2].mxu0 }
  0xf4   :  { %v103_v23 = vmul.f32 %v102_v20, %v1031_v18  ;;  %v811_v24 = vpop.f32.mrb[3].mxu0  ;;  %v284_v20 = vld [vmem:[#allocation3 + $0x3] sm:$0x1] }
  0xf6   :  { %885 = vtanh.f32 %v103_v23 }
 0x100   :  { %v886_v25 = vpop.eup %885 }
 0x101   :  { %v105_v27 = vmul.f32 %v886_v25, %v1031_v18 }
 0x103   :  { %v106_v28 = vadd.f32 %v105_v27, %v1034_v26 }
 0x105   :  { %113 = vrot.lane.b32.xlu0 %v106_v28, %s972_s0  ;;  %v111_v32 = vmul.f32 %v109_v31, %v106_v28 }
 0x177   :  { %v114_v29 = vpop.permute.xlu0 %113 }
 0x178   :  { %v116_v30 = vmul.f32 %v114_v29, %v106_v28 }
 0x17a   :  { %118 = vrot.lane.b32.xlu1 %v116_v30, %s971_s24 }
 0x1ec   :  { %v119_v33 = vpop.permute.xlu1 %118 }
 0x1ed   :  { %v121_v34 = vadd.f32 %v119_v33, %v111_v32 }
 0x1ef   :  { %887 = vtanh.f32 %v121_v34 }
 0x1f9   :  { %v888_v35 = vpop.eup %887 }
 0x1fa   :  { %124 = vrot.lane.b32.xlu0 %v888_v35, %s972_s0 }
 0x26c   :  { %v125_v36 = vpop.permute.xlu0 %124 }
 0x26d   :  { %v1041_v37 = vmul.f32 %v125_v36, %v106_v28 }
 0x26f   :  { %v135_v38 = vpack.c.bf16 %v1041_v37, %v1041_v37 }
 0x271   :  { %137 = vrot.lane.b32.xlu1 %v135_v38, %s971_s24 }
 0x2e3   :  { %v138_v39 = vpop.permute.xlu1 %137 }
 0x2e4   :  { %817 = vmatmul.mubr.msk.bf16.vlgmr.msra.gmra.mrb[0].mxu1 %vm58_vm1, %v138_v39 }
 0x2e5   :  { %829 = vmatpush3.bf16.msra.mxu1 %v1008_v5  ;;  %832 = vmatprep.mubr.msk.bf16.mxu1 %vm969_vm0, %v968_v0 }
 0x2e6   :  { %830 = vmatprep.subr.bf16.mxu1 %v968_v0 }
 0x2e9   :  { %831 = vmatpush3.bf16.msra.mxu1 %v1014_v9 }
 0x2ea   :  { %844 = vmatprep.subr.bf16.mxu1 %v968_v0 }
 0x3b7   :  { %v176_v41 = vpop.f32.mrb[0].mxu1 }
 0x3b8   :  { %v182_v42 = vadd.f32 %v176_v41, %v134_v40  ;;  %v818_v43 = vpop.f32.mrb[1].mxu1 }
 0x3b9   :  { %v179_v44 = vpop.f32.mrb[2].mxu1 }
 0x3ba   :  { %v183_v45 = vmul.f32 %v182_v42, %v1031_v18  ;;  %v819_v46 = vpop.f32.mrb[3].mxu1  ;;  %v359_v42 = vld [vmem:[#allocation3 + $0x4] sm:$0x1] }
 0x3bc   :  { %889 = vtanh.f32 %v183_v45 }
 0x3c6   :  { %v890_v47 = vpop.eup %889 }
 0x3c7   :  { %v185_v48 = vmul.f32 %v890_v47, %v1031_v18 }
 0x3c9   :  { %v186_v49 = vadd.f32 %v185_v48, %v1034_v26 }
 0x3cb   :  { %189 = vrot.lane.b32.xlu0 %v186_v49, %s972_s0  ;;  %v187_v52 = vmul.f32 %v186_v49, %v121_v34 }
 0x43d   :  { %v190_v50 = vpop.permute.xlu0 %189 }
 0x43e   :  { %v192_v51 = vmul.f32 %v190_v50, %v186_v49 }
 0x440   :  { %194 = vrot.lane.b32.xlu1 %v192_v51, %s971_s24 }
 0x4b2   :  { %v195_v53 = vpop.permute.xlu1 %194 }
 0x4b3   :  { %v197_v54 = vadd.f32 %v195_v53, %v187_v52 }
 0x4b5   :  { %891 = vtanh.f32 %v197_v54 }
 0x4bf   :  { %v892_v55 = vpop.eup %891 }
 0x4c0   :  { %200 = vrot.lane.b32.xlu0 %v892_v55, %s972_s0 }
 0x532   :  { %v201_v56 = vpop.permute.xlu0 %200 }
 0x533   :  { %v1059_v57 = vmul.f32 %v201_v56, %v186_v49 }
 0x535   :  { %v210_v58 = vpack.c.bf16 %v1059_v57, %v1059_v57 }
 0x537   :  { %212 = vrot.lane.b32.xlu1 %v210_v58, %s971_s24 }
 0x5a9   :  { %v213_v59 = vpop.permute.xlu1 %212 }
 0x5aa   :  { %825 = vmatmul.mubr.msk.bf16.vlgmr.msra.gmra.mrb[4].mxu0 %vm58_vm1, %v213_v59 }
 0x5ab   :  { %837 = vmatpush3.bf16.msra.mxu0 %v1008_v5  ;;  %840 = vmatprep.mubr.msk.bf16.mxu0 %vm969_vm0, %v968_v0 }
 0x5ac   :  { %838 = vmatprep.subr.bf16.mxu0 %v968_v0 }
 0x5af   :  { %839 = vmatpush3.bf16.msra.mxu0 %v1014_v9 }
 0x5b0   :  { %852 = vmatprep.subr.bf16.mxu0 %v968_v0 }
 0x67d   :  { %v251_v61 = vpop.f32.mrb[4].mxu0 }
 0x67e   :  { %v257_v62 = vadd.f32 %v251_v61, %v209_v60  ;;  %v826_v63 = vpop.f32.mrb[5].mxu0 }
 0x67f   :  { %v254_v1 = vpop.f32.mrb[6].mxu0  ;;  %v434_v63 = vld [vmem:[#allocation3 + $0x5] sm:$0x1] }
 0x680   :  { %v258_v2 = vmul.f32 %v257_v62, %v1031_v18  ;;  %v827_v3 = vpop.f32.mrb[7].mxu0 }
 0x682   :  { %893 = vtanh.f32 %v258_v2 }
 0x68c   :  { %v894_v4 = vpop.eup %893 }
 0x68d   :  { %v260_v6 = vmul.f32 %v894_v4, %v1031_v18 }
 0x68f   :  { %v261_v7 = vadd.f32 %v260_v6, %v1034_v26 }
 0x691   :  { %264 = vrot.lane.b32.xlu0 %v261_v7, %s972_s0  ;;  %v262_v11 = vmul.f32 %v261_v7, %v197_v54 }
 0x703   :  { %v265_v8 = vpop.permute.xlu0 %264 }
 0x704   :  { %v267_v10 = vmul.f32 %v265_v8, %v261_v7 }
 0x706   :  { %269 = vrot.lane.b32.xlu1 %v267_v10, %s971_s24 }
 0x778   :  { %v270_v12 = vpop.permute.xlu1 %269 }
 0x779   :  { %v272_v13 = vadd.f32 %v270_v12, %v262_v11 }
 0x77b   :  { %895 = vtanh.f32 %v272_v13 }
 0x785   :  { %v896_v14 = vpop.eup %895 }
 0x786   :  { %275 = vrot.lane.b32.xlu0 %v896_v14, %s972_s0 }
 0x7f8   :  { %v276_v15 = vpop.permute.xlu0 %275 }
 0x7f9   :  { %v1077_v16 = vmul.f32 %v276_v15, %v261_v7 }
 0x7fb   :  { %v285_v17 = vpack.c.bf16 %v1077_v16, %v1077_v16 }
 0x7fd   :  { %287 = vrot.lane.b32.xlu1 %v285_v17, %s971_s24 }
 0x86f   :  { %v288_v19 = vpop.permute.xlu1 %287 }
 0x870   :  { %833 = vmatmul.mubr.msk.bf16.vlgmr.msra.gmra.mrb[4].mxu1 %vm58_vm1, %v288_v19 }
 0x871   :  { %845 = vmatpush3.bf16.msra.mxu1 %v1008_v5  ;;  %848 = vmatprep.mubr.msk.bf16.mxu1 %vm969_vm0, %v968_v0 }
 0x872   :  { %846 = vmatprep.subr.bf16.mxu1 %v968_v0 }
 0x875   :  { %847 = vmatpush3.bf16.msra.mxu1 %v1014_v9 }
 0x876   :  { %860 = vmatprep.subr.bf16.mxu1 %v968_v0 }
 0x943   :  { %v326_v21 = vpop.f32.mrb[4].mxu1 }
 0x944   :  { %v332_v22 = vadd.f32 %v326_v21, %v284_v20  ;;  %v834_v23 = vpop.f32.mrb[5].mxu1 }
 0x945   :  { %v329_v24 = vpop.f32.mrb[6].mxu1 }
 0x946   :  { %v333_v25 = vmul.f32 %v332_v22, %v1031_v18  ;;  %v835_v27 = vpop.f32.mrb[7].mxu1  ;;  %v509_v22 = vld [vmem:[#allocation3 + $0x6] sm:$0x1] }
 0x948   :  { %897 = vtanh.f32 %v333_v25 }
 0x952   :  { %v898_v28 = vpop.eup %897 }
 0x953   :  { %v335_v29 = vmul.f32 %v898_v28, %v1031_v18 }
 0x955   :  { %v336_v30 = vadd.f32 %v335_v29, %v1034_v26 }
 0x957   :  { %339 = vrot.lane.b32.xlu0 %v336_v30, %s972_s0  ;;  %v337_v33 = vmul.f32 %v336_v30, %v272_v13 }
 0x9c9   :  { %v340_v31 = vpop.permute.xlu0 %339 }
 0x9ca   :  { %v342_v32 = vmul.f32 %v340_v31, %v336_v30 }
 0x9cc   :  { %344 = vrot.lane.b32.xlu1 %v342_v32, %s971_s24 }
 0xa3e   :  { %v345_v34 = vpop.permute.xlu1 %344 }
 0xa3f   :  { %v347_v35 = vadd.f32 %v345_v34, %v337_v33 }
 0xa41   :  { %899 = vtanh.f32 %v347_v35 }
 0xa4b   :  { %v900_v36 = vpop.eup %899 }
 0xa4c   :  { %350 = vrot.lane.b32.xlu0 %v900_v36, %s972_s0 }
 0xabe   :  { %v351_v38 = vpop.permute.xlu0 %350 }
 0xabf   :  { %v1095_v39 = vmul.f32 %v351_v38, %v336_v30 }
 0xac1   :  { %v360_v40 = vpack.c.bf16 %v1095_v39, %v1095_v39 }
 0xac3   :  { %362 = vrot.lane.b32.xlu1 %v360_v40, %s971_s24 }
 0xb35   :  { %v363_v41 = vpop.permute.xlu1 %362 }
 0xb36   :  { %841 = vmatmul.mubr.msk.bf16.vlgmr.msra.gmra.mrb[8].mxu0 %vm58_vm1, %v363_v41 }
 0xb37   :  { %853 = vmatpush3.bf16.msra.mxu0 %v1008_v5  ;;  %856 = vmatprep.mubr.msk.bf16.mxu0 %vm969_vm0, %v968_v0 }
 0xb38   :  { %854 = vmatprep.subr.bf16.mxu0 %v968_v0 }
 0xb3b   :  { %855 = vmatpush3.bf16.msra.mxu0 %v1014_v9 }
 0xb3c   :  { %868 = vmatprep.subr.mxu0 %v968_v0 }
 0xc09   :  { %v401_v43 = vpop.f32.mrb[8].mxu0 }
 0xc0a   :  { %v407_v44 = vadd.f32 %v401_v43, %v359_v42  ;;  %v842_v45 = vpop.f32.mrb[9].mxu0 }
 0xc0b   :  { %v404_v46 = vpop.f32.mrb[10].mxu0 }
 0xc0c   :  { %v408_v47 = vmul.f32 %v407_v44, %v1031_v18  ;;  %v843_v48 = vpop.f32.mrb[11].mxu0  ;;  %v584_v44 = vld [vmem:[#allocation3 + $0x7] sm:$0x1] }
 0xc0e   :  { %901 = vtanh.f32 %v408_v47 }
 0xc18   :  { %v902_v49 = vpop.eup %901 }
 0xc19   :  { %v410_v50 = vmul.f32 %v902_v49, %v1031_v18 }
 0xc1b   :  { %v411_v51 = vadd.f32 %v410_v50, %v1034_v26 }
 0xc1d   :  { %414 = vrot.lane.b32.xlu0 %v411_v51, %s972_s0  ;;  %v412_v54 = vmul.f32 %v411_v51, %v347_v35 }
 0xc8f   :  { %v415_v52 = vpop.permute.xlu0 %414 }
 0xc90   :  { %v417_v53 = vmul.f32 %v415_v52, %v411_v51 }
 0xc92   :  { %419 = vrot.lane.b32.xlu1 %v417_v53, %s971_s24 }
 0xd04   :  { %v420_v55 = vpop.permute.xlu1 %419 }
 0xd05   :  { %v422_v56 = vadd.f32 %v420_v55, %v412_v54 }
 0xd07   :  { %903 = vtanh.f32 %v422_v56 }
 0xd11   :  { %v904_v58 = vpop.eup %903 }
 0xd12   :  { %425 = vrot.lane.b32.xlu0 %v904_v58, %s972_s0 }
 0xd84   :  { %v426_v59 = vpop.permute.xlu0 %425 }
 0xd85   :  { %v1113_v60 = vmul.f32 %v426_v59, %v411_v51 }
 0xd87   :  { %v435_v61 = vpack.c.bf16 %v1113_v60, %v1113_v60 }
 0xd89   :  { %437 = vrot.lane.b32.xlu1 %v435_v61, %s971_s24 }
 0xdfb   :  { %v438_v62 = vpop.permute.xlu1 %437 }
 0xdfc   :  { %849 = vmatmul.mubr.msk.bf16.vlgmr.msra.gmra.mrb[8].mxu1 %vm58_vm1, %v438_v62 }
 0xdfd   :  { %861 = vmatpush3.bf16.msra.mxu1 %v1008_v5  ;;  %864 = vmatprep.mubr.msk.bf16.mxu1 %vm969_vm0, %v968_v0 }
 0xdfe   :  { %862 = vmatprep.subr.bf16.mxu1 %v968_v0 }
 0xe01   :  { %863 = vmatpush3.bf16.msra.mxu1 %v1014_v9 }
 0xecf   :  { %v476_v1 = vpop.f32.mrb[8].mxu1 }
 0xed0   :  { %v482_v2 = vadd.f32 %v476_v1, %v434_v63  ;;  %v850_v3 = vpop.f32.mrb[9].mxu1  ;;  %v660_v63 = vld [vmem:[#allocation4 + $0x23] sm:$0x1] }
 0xed1   :  { %v479_v4 = vpop.f32.mrb[10].mxu1 }
 0xed2   :  { %v483_v6 = vmul.f32 %v482_v2, %v1031_v18  ;;  %v851_v7 = vpop.f32.mrb[11].mxu1 }
 0xed4   :  { %905 = vtanh.f32 %v483_v6  ;;  %v659_v6 = vld [vmem:[#allocation4 + $0x22] sm:$0x1] }
 0xede   :  { %v906_v8 = vpop.eup %905 }
 0xedf   :  { %v485_v10 = vmul.f32 %v906_v8, %v1031_v18 }
 0xee1   :  { %v486_v5 = vadd.f32 %v485_v10, %v1034_v26 }
 0xee3   :  { %489 = vrot.lane.b32.xlu0 %v486_v5, %s972_s0  ;;  %v487_v9 = vmul.f32 %v486_v5, %v422_v56 }
 0xf55   :  { %v490_v11 = vpop.permute.xlu0 %489 }
 0xf56   :  { %v492_v12 = vmul.f32 %v490_v11, %v486_v5 }
 0xf58   :  { %494 = vrot.lane.b32.xlu1 %v492_v12, %s971_s24 }
 0xfca   :  { %v495_v13 = vpop.permute.xlu1 %494 }
 0xfcb   :  { %v497_v14 = vadd.f32 %v495_v13, %v487_v9 }
 0xfcd   :  { %907 = vtanh.f32 %v497_v14 }
 0xfd7   :  { %v908_v15 = vpop.eup %907 }
 0xfd8   :  { %500 = vrot.lane.b32.xlu0 %v908_v15, %s972_s0 }
0x104a   :  { %v501_v17 = vpop.permute.xlu0 %500 }
0x104b   :  { %v1130_v19 = vmul.f32 %v501_v17, %v486_v5 }
0x104d   :  { %v510_v20 = vpack.c.bf16 %v1130_v19, %v1130_v19 }
0x104f   :  { %512 = vrot.lane.b32.xlu1 %v510_v20, %s971_s24 }
0x10c1   :  { %v513_v21 = vpop.permute.xlu1 %512 }
0x10c2   :  { %857 = vmatmul.mubr.msk.bf16.vlgmr.msra.gmra.mrb[12].mxu0 %vm58_vm1, %v513_v21 }
0x10c3   :  { %870 = vmatprep.mubr.msk.f32.mxu0 %vm969_vm0, %v968_v0 }
0x1195   :  { %v551_v23 = vpop.f32.mrb[12].mxu0 }
0x1196   :  { %v557_v24 = vadd.f32 %v551_v23, %v509_v22  ;;  %v858_v25 = vpop.f32.mrb[13].mxu0 }
0x1197   :  { %v554_v27 = vpop.f32.mrb[14].mxu0 }
0x1198   :  { %v558_v28 = vmul.f32 %v557_v24, %v1031_v18  ;;  %v859_v29 = vpop.f32.mrb[15].mxu0 }
0x119a   :  { %909 = vtanh.f32 %v558_v28 }
0x11a4   :  { %v910_v30 = vpop.eup %909 }
0x11a5   :  { %v560_v31 = vmul.f32 %v910_v30, %v1031_v18 }
0x11a7   :  { %v561_v32 = vadd.f32 %v560_v31, %v1034_v26 }
0x11a9   :  { %564 = vrot.lane.b32.xlu0 %v561_v32, %s972_s0  ;;  %v562_v0 = vmul.f32 %v561_v32, %v497_v14 }
0x121b   :  { %v565_v33 = vpop.permute.xlu0 %564 }
0x121c   :  { %v567_v34 = vmul.f32 %v565_v33, %v561_v32 }
0x121e   :  { %569 = vrot.lane.b32.xlu1 %v567_v34, %s971_s24 }
0x1290   :  { %v570_v35 = vpop.permute.xlu1 %569 }
0x1291   :  { %v572_v36 = vadd.f32 %v570_v35, %v562_v0 }
0x1293   :  { %911 = vtanh.f32 %v572_v36 }
0x129d   :  { %v912_v38 = vpop.eup %911 }
0x129e   :  { %575 = vrot.lane.b32.xlu0 %v912_v38, %s972_s0 }
0x1310   :  { %v576_v40 = vpop.permute.xlu0 %575 }
0x1311   :  { %v578_v41 = vmul.f32 %v576_v40, %v561_v32 }
0x1313   :  { %v585_v42 = vpack.c.bf16 %v578_v41, %v578_v41 }
0x1315   :  { %587 = vrot.lane.b32.xlu1 %v585_v42, %s971_s24 }
0x1387   :  { %v588_v43 = vpop.permute.xlu1 %587 }
0x1388   :  { %865 = vmatmul.mubr.msk.bf16.vlgmr.msra.gmra.mrb[12].mxu1 %vm58_vm1, %v588_v43 }
0x145b   :  { %v626_v45 = vpop.f32.mrb[12].mxu1 }
0x145c   :  { %v632_v46 = vadd.f32 %v626_v45, %v584_v44  ;;  %v866_v47 = vpop.f32.mrb[13].mxu1 }
0x145d   :  { %v629_v48 = vpop.f32.mrb[14].mxu1 }
0x145e   :  { %v633_v49 = vmul.f32 %v632_v46, %v1031_v18  ;;  %v867_v50 = vpop.f32.mrb[15].mxu1 }
0x1460   :  { %913 = vtanh.f32 %v633_v49 }
0x146a   :  { %v914_v51 = vpop.eup %913 }
0x146b   :  { %v635_v52 = vmul.f32 %v914_v51, %v1031_v18 }
0x146d   :  { %v636_v53 = vadd.f32 %v635_v52, %v1034_v26 }
0x146f   :  { %639 = vrot.lane.b32.xlu0 %v636_v53, %s972_s0  ;;  %v637_v18 = vmul.f32 %v636_v53, %v572_v36 }
0x14e1   :  { %v640_v54 = vpop.permute.xlu0 %639 }
0x14e2   :  { %v642_v55 = vmul.f32 %v640_v54, %v636_v53 }
0x14e4   :  { %644 = vrot.lane.b32.xlu1 %v642_v55, %s971_s24 }
0x14e8   :  { %129 = vrot.lane.b32.xlu1 %v1041_v37, %s971_s24 }
0x14ec   :  { %280 = vrot.lane.b32.xlu1 %v1077_v16, %s971_s24 }
0x14f0   :  { %430 = vrot.lane.b32.xlu1 %v1113_v60, %s971_s24 }
0x14f4   :  { %580 = vrot.lane.b32.xlu1 %v578_v41, %s971_s24 }
0x14f8   :  { %664 = vperm.xlu1 %884, %v660_v63  }
0x1556   :  { %v645_v56 = vpop.permute.xlu1 %644 }
0x1557   :  { %v647_v26 = vadd.f32 %v645_v56, %v637_v18 }
0x1559   :  { %915 = vtanh.f32 %v647_v26 }
0x155a   :  { %v130_v58 = vpop.permute.xlu1 %129 }
0x155b   :  { %133 = vst.msk [vmem:[#allocation2] sm:$0x1] %vm132_vm2, %v130_v58 }
0x155e   :  { %v281_v59 = vpop.permute.xlu1 %280 }
0x155f   :  { %283 = vst.msk [vmem:[#allocation2 + $0x2] sm:$0x1] %vm132_vm2, %v281_v59 }
0x1562   :  { %v431_v37 = vpop.permute.xlu1 %430 }
0x1563   :  { %v916_v61 = vpop.eup %915  ;;  %433 = vst.msk [vmem:[#allocation2 + $0x4] sm:$0x1] %vm132_vm2, %v431_v37 }
0x1564   :  { %650 = vrot.lane.b32.xlu0 %v916_v61, %s972_s0 }
0x1566   :  { %v581_v16 = vpop.permute.xlu1 %580 }
0x1567   :  { %583 = vst.msk [vmem:[#allocation2 + $0x6] sm:$0x1] %vm132_vm2, %v581_v16 }
0x1568   :  { %205 = vrot.lane.b32.xlu0 %v1059_v57, %s971_s24 }
0x156c   :  { %355 = vrot.lane.b32.xlu0 %v1095_v39, %s971_s24 }
0x1570   :  { %505 = vrot.lane.b32.xlu0 %v1130_v19, %s971_s24 }
0x1577   :  { %v665_v7 = vpop.permute.xlu1 %664 }
0x15d6   :  { %v651_v60 = vpop.permute.xlu0 %650 }
0x15d7   :  { %v653_v62 = vmul.f32 %v651_v60, %v636_v53 }
0x15d9   :  { %655 = vrot.lane.b32.xlu0 %v653_v62, %s971_s24 }
0x15da   :  { %v206_v1 = vpop.permute.xlu0 %205 }
0x15db   :  { %208 = vst.msk [vmem:[#allocation2 + $0x1] sm:$0x1] %vm132_vm2, %v206_v1 }
0x15dd   :  { %747 = vrot.lane.b32.xlu0 %v647_v26, %s973_s25 }
0x15de   :  { %v356_v2 = vpop.permute.xlu0 %355 }
0x15df   :  { %358 = vst.msk [vmem:[#allocation2 + $0x3] sm:$0x1] %vm132_vm2, %v356_v2 }
0x15e2   :  { %v506_v57 = vpop.permute.xlu0 %505 }
0x15e3   :  { %508 = vst.msk [vmem:[#allocation2 + $0x5] sm:$0x1] %vm132_vm2, %v506_v57 }
0x164b   :  { %v656_v39 = vpop.permute.xlu0 %655 }
0x164c   :  { %658 = vst.msk [vmem:[#allocation2 + $0x7] sm:$0x1] %vm132_vm2, %v656_v39  ;;  %745 = vst.msk [vmem:[#allocation7 + $0x1] sm:$0x1] %vm132_vm2, %v656_v39 }
0x164f   :  { %v748_v3 = vpop.permute.xlu0 %747 }
0x1650   :  { %750 = vst.msk [vmem:[#allocation7 + $0x2] sm:$0x1] %vm132_vm2, %v748_v3 }
0x1653   :  { %v661_v4 = vld [vmem:[#allocation2] sm:$0xff] }
0x1654   :  { %869 = vmatpush3.xpose.msk.msra.mxu0 %vm58_vm1, %v661_v4 }
0x1657   :  { %871 = vmatmul.mubr.msk.f32.vlgmr.msra.gmra.mrb[16].mxu0 %vm58_vm1, %v659_v6 }
0x172a   :  { %v739_v8 = vpop.f32.mrb[16].mxu0 }
0x172b   :  { %v740_v10 = vadd.f32 %v739_v8, %v665_v7  ;;  %v872_v5 = vpop.f32.mrb[17].mxu0 }
0x172d   :  { %744 = vst.msk [vmem:[#allocation7] sm:$0x1] %vm743_vm3, %v740_v10 }
0x172e   :  { %950 = shalt.err (!%p947_p12)
}
0x172f   :  { %s951_s3 = scalar_lea.hbm %s1192_s2, 64 }
0x1730   :  { %p952_p13 = scmp.ne.s32.totalorder %s1192_s2, %s951_s3  ;;  %p955_p0 = scmp.lt.u32.totalorder %s951_s3, %s1192_s2 }
0x1732   :  { %p957_p1 = pnand %p955_p0, %p952_p13 }
0x1734   :  { %960 = shalt.err (!%p957_p1)
}
0x1735   :  { %760 = dma.vmem_to_hbm [thread:$0]  %s758_s27, 64, %s1192_s2, [#allocation6]  }
0x1736   :  { %963 = dma.done.wait [#allocation6], 64  }
0x1737   :  { %964 = vsyncadd [#allocation6], 4294967232 }
0x1738   :  { %764 = vsyncpa [#allocation5], 1 }
0x1739   :  { %765 = vsyncpa [#allocation6], 1 }

</bundles_post_ra>
